<compile_context>
chip_gen: v6e
topology: v6e:2x2x1
jax: 0.10.0
libtpu: 0.0.40
codegen_flags: <defaults>
</compile_context>

<pallas_src>
import jax
import jax.numpy as jnp
from jax import lax
from jax.experimental import pallas as pl
from jax.experimental.pallas import tpu as pltpu

LANE = 128
SUBLANE = 8


def _round_up(x, m):
    return (x + m - 1) // m * m


def _vmem_capacity_bytes():
    """Physical VMEM per core; falls back to v7x's 64 MiB (the smallest)."""
    try:
        cap = int(getattr(pltpu.get_tpu_info(), "vmem_capacity_bytes", 0) or 0)
        if cap > 0:
            return cap
    except Exception:
        pass
    return 64 * 1024 * 1024


def _tile_bytes(lead, sublane, lane, itemsize=4):
    """VMEM bytes of a (lead, sublane, lane) f32 block after (8,128) tiling."""
    return lead * _round_up(sublane, SUBLANE) * _round_up(lane, LANE) * itemsize


def _choose_block(G, B, S, H, A, a_out, genomes_per_step):
    """Pick genome block size gb, padded population g_pad and a VMEM limit.

    - No divisor search: G is padded with dummy genomes up to a multiple of gb.
    - >= 2 grid steps whenever G > 1 (megacore split on v7x; DMA/compute overlap).
    - gb clamped so pipeline buffers + in-kernel temporaries fit the chip's VMEM
      (96 MiB limit on v5e/v6e's 128 MiB, 48 MiB on v7x's 64 MiB).
    """
    vmem_limit = _vmem_capacity_bytes() * 3 // 4
    budget = vmem_limit // 2                      # headroom for compiler scratch
    per_genome = (_tile_bytes(1, B, S) + _tile_bytes(1, H, S)
                  + _tile_bytes(1, A, H) + _tile_bytes(1, B, a_out))
    gb_max = max(1, budget // (3 * per_genome))   # 2 pipeline buffers + temporaries
    gb = max(1, min(int(genomes_per_step), int(G), int(gb_max)))
    if G > 1:
        gb = min(gb, pl.cdiv(G, 2))               # guarantee >= 2 grid steps
    g_pad = pl.cdiv(G, gb) * gb
    return gb, g_pad, int(vmem_limit)


def _pad_population(x, w1, w2, g_pad):
    G = x.shape[0]
    if g_pad == G:
        return x, w1, w2
    pad = ((0, g_pad - G), (0, 0), (0, 0))
    return jnp.pad(x, pad), jnp.pad(w1, pad), jnp.pad(w2, pad)


# ---------------------------------------------------------------------------
# Kernels
# ---------------------------------------------------------------------------

def _net_forward_kernel(x_ref, w1_ref, w2_ref, o_ref):
    """softmax(relu(relu(x @ W1^T) @ W2^T)) for one block of genomes.

    x_ref:  (Gb, B, S), w1_ref: (Gb, H, S), w2_ref: (Gb, A, H) -- PyTorch
    (out_features, in_features) layout, unpadded.  o_ref: (Gb, B, A_out) with
    A_out lane-dense (128); only the first A lanes carry probabilities.
    """
    x = x_ref[...]
    w1 = w1_ref[...]
    w2 = w2_ref[...]

    h = jnp.maximum(jnp.einsum("gbs,ghs->gbh", x, w1,
                               preferred_element_type=jnp.float32), 0.0)
    z = jnp.maximum(jnp.einsum("gbh,gah->gba", h, w2,
                               preferred_element_type=jnp.float32), 0.0)

    # Exact softmax over the A real action lanes (matches F.softmax).
    z = z - jnp.max(z, axis=-1, keepdims=True)
    e = jnp.exp(z)
    p = e / jnp.sum(e, axis=-1, keepdims=True)    # exact divide: rows sum to 1

    a = p.shape[-1]
    if o_ref.shape[-1] != a:
        # Lane-dense output block: zero-fill, then slice-store the real lanes.
        o_ref[...] = jnp.zeros_like(o_ref)
        o_ref[:, :, :a] = p.astype(o_ref.dtype)
    else:
        o_ref[...] = p.astype(o_ref.dtype)


def _net_action_kernel(x_ref, w1_ref, w2_ref, a_ref):
    """argmax(relu(relu(x @ W1^T) @ W2^T)) for one block of genomes.

    Softmax is strictly monotone per row, so it is skipped; only a (Gb, 1, 1)
    int32 action tensor is written (no logits writeback).
    """
    x = x_ref[...]
    w1 = w1_ref[...]
    w2 = w2_ref[...]

    h = jnp.maximum(jnp.einsum("gbs,ghs->gbh", x, w1,
                               preferred_element_type=jnp.float32), 0.0)
    z = jnp.maximum(jnp.einsum("gbh,gah->gba", h, w2,
                               preferred_element_type=jnp.float32), 0.0)

    # First flat index attaining the max (same tie-break as torch/jnp argmax).
    a_dim = z.shape[2]
    zmax = jnp.max(z, axis=(1, 2), keepdims=True)
    flat_idx = (lax.broadcasted_iota(jnp.int32, z.shape, 1) * a_dim
                + lax.broadcasted_iota(jnp.int32, z.shape, 2))
    sentinel = jnp.int32(z.shape[1] * z.shape[2])
    first = jnp.min(jnp.where(z == zmax, flat_idx, sentinel),
                    axis=(1, 2), keepdims=True)          # (Gb, 1, 1)
    a_ref[...] = first.astype(a_ref.dtype)


# ---------------------------------------------------------------------------
# Wrappers
# ---------------------------------------------------------------------------

def net_forward_population(x, fc1_weights, fc2_weights, *, genomes_per_step=512):
    """Softmax action probabilities for a whole GA population in one pallas_call.

    x:            (G, B, state_size)
    fc1_weights:  (G, hidden, state)   PyTorch (out_features, in_features) layout
    fc2_weights:  (G, action, hidden)
    returns:      (G, B, action) softmax probabilities (float32).
    """
    x = jnp.asarray(x, jnp.float32)
    w1 = jnp.asarray(fc1_weights, jnp.float32)
    w2 = jnp.asarray(fc2_weights, jnp.float32)
    G, B, S = x.shape
    G1, H, S1 = w1.shape
    G2, A, H2 = w2.shape
    assert G == G1 == G2 and S == S1 and H == H2

    a_out = _round_up(A, LANE)                    # only the OUTPUT is lane-padded
    gb, g_pad, vmem_limit = _choose_block(G, B, S, H, A, a_out, genomes_per_step)
    x, w1, w2 = _pad_population(x, w1, w2, g_pad)

    out = pl.pallas_call(
        _net_forward_kernel,
        out_shape=jax.ShapeDtypeStruct((g_pad, B, a_out), jnp.float32),
        grid_spec=pltpu.PrefetchScalarGridSpec(
            num_scalar_prefetch=0,
            grid=(g_pad // gb,),
            in_specs=[
                pl.BlockSpec((gb, B, S), lambda g: (g, 0, 0)),
                pl.BlockSpec((gb, H, S), lambda g: (g, 0, 0)),
                pl.BlockSpec((gb, A, H), lambda g: (g, 0, 0)),
            ],
            out_specs=pl.BlockSpec((gb, B, a_out), lambda g: (g, 0, 0)),
        ),
        compiler_params=pltpu.CompilerParams(
            dimension_semantics=("parallel",),    # genome blocks split across TCs
            vmem_limit_bytes=vmem_limit,
        ),
        cost_estimate=pl.CostEstimate(
            flops=2 * g_pad * B * (S * H + H * A),
            transcendentals=g_pad * B * A,
            bytes_accessed=4 * (x.size + w1.size + w2.size + g_pad * B * a_out),
        ),
    )(x, w1, w2)

    return out[:G, :, :A]


def get_actions_population(states, fc1_weights, fc2_weights, *, genomes_per_step=512):
    """Greedy action per genome, one observation each (mirrors Net.get_action).

    states: (G, state_size) or (G, 1, state_size); returns int32 (G,) actions.
    """
    x = jnp.asarray(states, jnp.float32)
    if x.ndim == 2:
        x = x[:, None, :]
    w1 = jnp.asarray(fc1_weights, jnp.float32)
    w2 = jnp.asarray(fc2_weights, jnp.float32)
    G, B, S = x.shape
    assert B == 1, "action path takes one observation per genome, like Net.get_action"
    _, H, _ = w1.shape
    _, A, _ = w2.shape

    gb, g_pad, vmem_limit = _choose_block(G, B, S, H, A, 1, genomes_per_step)
    x, w1, w2 = _pad_population(x, w1, w2, g_pad)

    actions = pl.pallas_call(
        _net_action_kernel,
        out_shape=jax.ShapeDtypeStruct((g_pad, 1, 1), jnp.int32),
        grid_spec=pltpu.PrefetchScalarGridSpec(
            num_scalar_prefetch=0,
            grid=(g_pad // gb,),
            in_specs=[
                pl.BlockSpec((gb, B, S), lambda g: (g, 0, 0)),
                pl.BlockSpec((gb, H, S), lambda g: (g, 0, 0)),
                pl.BlockSpec((gb, A, H), lambda g: (g, 0, 0)),
            ],
            out_specs=pl.BlockSpec((gb, 1, 1), lambda g: (g, 0, 0)),
        ),
        compiler_params=pltpu.CompilerParams(
            dimension_semantics=("parallel",),
            vmem_limit_bytes=vmem_limit,
        ),
        cost_estimate=pl.CostEstimate(
            flops=2 * g_pad * B * (S * H + H * A),
            transcendentals=0,
            bytes_accessed=4 * (x.size + w1.size + w2.size + g_pad),
        ),
    )(x, w1, w2)

    return actions[:G, 0, 0]


def net_forward(x, fc1_weight, fc2_weight):
    """Single-Net forward matching the PyTorch module: x (B, S) -> softmax (B, A)."""
    x = jnp.asarray(x, jnp.float32)
    if x.ndim == 1:
        x = x[None, :]
    return net_forward_population(x[None], jnp.asarray(fc1_weight)[None],
                                  jnp.asarray(fc2_weight)[None])[0]


def get_action(state, fc1_weight, fc2_weight):
    """Mirrors Net.get_action for a single observation: returns an int32 action."""
    S = fc1_weight.shape[-1]
    state = jnp.asarray(state, jnp.float32).reshape(1, S)
    return get_actions_population(state[None], jnp.asarray(fc1_weight)[None],
                                  jnp.asarray(fc2_weight)[None])[0]


def _reference_population(x, w1, w2):
    h = jnp.maximum(jnp.einsum("gbs,ghs->gbh", x, w1), 0.0)
    z = jnp.maximum(jnp.einsum("gbh,gah->gba", h, w2), 0.0)
    return jax.nn.softmax(z, axis=-1)


if __name__ == "__main__":
    # Small shapes consistent with the module: population=16, batch=2, state=16,
    # hidden=32, action=8.
    G, B, STATE, HIDDEN, ACTION = 16, 2, 16, 32, 8

    key = jax.random.PRNGKey(0)
    kx, k1, k2 = jax.random.split(key, 3)

    states = jax.random.normal(kx, (G, B, STATE), dtype=jnp.float32)
    # Deterministic synthetic "GA genome" weights, PyTorch (out, in) layout.
    fc1_weights = jax.random.normal(k1, (G, HIDDEN, STATE), dtype=jnp.float32) * 0.1
    fc2_weights = jax.random.normal(k2, (G, ACTION, HIDDEN), dtype=jnp.float32) * 0.1

    ref = _reference_population(states, fc1_weights, fc2_weights)

    # Whole population in one gridded pallas_call (>= 2 grid steps).
    probs = jax.block_until_ready(
        net_forward_population(states, fc1_weights, fc2_weights, genomes_per_step=8))
    assert probs.shape == (G, B, ACTION)
    assert bool(jnp.all(jnp.abs(probs - ref) < 1e-4))
    assert bool(jnp.all(jnp.abs(jnp.sum(probs, axis=-1) - 1.0) < 1e-5))

    # Ragged (prime) population size: exercises the dummy-genome padding path.
    Gr = 13
    probs_r = jax.block_until_ready(
        net_forward_population(states[:Gr], fc1_weights[:Gr], fc2_weights[:Gr],
                               genomes_per_step=8))
    assert probs_r.shape == (Gr, B, ACTION)
    assert bool(jnp.all(jnp.abs(probs_r - ref[:Gr]) < 1e-4))

    # Single-Net path mirrors the original module exactly.
    single = jax.block_until_ready(net_forward(states[0], fc1_weights[0], fc2_weights[0]))
    assert single.shape == (B, ACTION)
    assert bool(jnp.all(jnp.abs(single - ref[0]) < 1e-4))

    # Greedy-action path (softmax skipped, argmax fused into the kernel).
    act = jax.block_until_ready(get_action(states[0, 0], fc1_weights[0], fc2_weights[0]))
    assert int(act) == int(jnp.argmax(ref[0, 0]))

    pop_actions = jax.block_until_ready(
        get_actions_population(states[:, 0, :], fc1_weights, fc2_weights,
                               genomes_per_step=8))
    assert pop_actions.shape == (G,)
    assert bool(jnp.all(pop_actions == jnp.argmax(ref[:, 0, :], axis=-1)))

    print("KERNEL_OK")
</pallas_src>

<mosaic_0001>
module attributes {stable_mosaic.version = 11 : i64} {
  func.func @_net_forward_kernel(%arg0: i32, %arg1: memref<8x2x16xf32, #tpu.memory_space<vmem>>, %arg2: memref<8x32x16xf32, #tpu.memory_space<vmem>>, %arg3: memref<8x8x32xf32, #tpu.memory_space<vmem>>, %arg4: memref<8x2x128xf32, #tpu.memory_space<vmem>>) attributes {dimension_semantics = [#tpu.dimension_semantics<parallel>], iteration_bounds = array<i64: 2>, scalar_prefetch = 0 : i64, scratch_operands = 0 : i64, tpu.core_type = #tpu.core_type<tc>, window_params = [{transform_indices = @transform_0, window_bounds = array<i64: 8, 2, 16>}, {transform_indices = @transform_1, window_bounds = array<i64: 8, 32, 16>}, {transform_indices = @transform_2, window_bounds = array<i64: 8, 8, 32>}, {transform_indices = @transform_3, window_bounds = array<i64: 8, 2, 128>}]} {
    %c0 = arith.constant 0 : index
    %c0_0 = arith.constant 0 : index
    %c0_1 = arith.constant 0 : index
    %0 = vector.load %arg1[%c0, %c0_0, %c0_1] : memref<8x2x16xf32, #tpu.memory_space<vmem>>, vector<8x2x16xf32>
    %c0_2 = arith.constant 0 : index
    %c0_3 = arith.constant 0 : index
    %c0_4 = arith.constant 0 : index
    %1 = vector.load %arg2[%c0_2, %c0_3, %c0_4] : memref<8x32x16xf32, #tpu.memory_space<vmem>>, vector<8x32x16xf32>
    %c0_5 = arith.constant 0 : index
    %c0_6 = arith.constant 0 : index
    %c0_7 = arith.constant 0 : index
    %2 = vector.load %arg3[%c0_5, %c0_6, %c0_7] : memref<8x8x32xf32, #tpu.memory_space<vmem>>, vector<8x8x32xf32>
    "tpu.trace_start"() <{level = 10 : i32, message = "gbs,ghs->gbh"}> : () -> ()
    %cst = arith.constant dense<0.000000e+00> : vector<8x2x32xf32>
    %3 = tpu.matmul %0, %1, %cst {dimension_numbers = #tpu.dot_dimension_numbers<[2], [2], [1], [1], [0, 0, 0, 1, 1, 1], [0], [0]>} : vector<8x2x16xf32>, vector<8x32x16xf32>, vector<8x2x32xf32> -> vector<8x2x32xf32>
    "tpu.trace_stop"() : () -> ()
    %cst_8 = arith.constant 0.000000e+00 : f32
    %4 = vector.broadcast %cst_8 : f32 to vector<8x2x32xf32>
    %5 = arith.maximumf %3, %4 : vector<8x2x32xf32>
    "tpu.trace_start"() <{level = 10 : i32, message = "gbh,gah->gba"}> : () -> ()
    %cst_9 = arith.constant dense<0.000000e+00> : vector<8x2x8xf32>
    %6 = tpu.matmul %5, %2, %cst_9 {dimension_numbers = #tpu.dot_dimension_numbers<[2], [2], [1], [1], [0, 0, 0, 1, 1, 1], [0], [0]>} : vector<8x2x32xf32>, vector<8x8x32xf32>, vector<8x2x8xf32> -> vector<8x2x8xf32>
    "tpu.trace_stop"() : () -> ()
    %cst_10 = arith.constant 0.000000e+00 : f32
    %7 = vector.broadcast %cst_10 : f32 to vector<8x2x8xf32>
    %8 = arith.maximumf %6, %7 : vector<8x2x8xf32>
    %cst_11 = arith.constant dense<0xFF800000> : vector<8x2xf32>
    %9 = vector.multi_reduction <maximumf>, %8, %cst_11 [2] : vector<8x2x8xf32> to vector<8x2xf32>
    %10 = vector.shape_cast %9 : vector<8x2xf32> to vector<8x2x1xf32>
    %11 = vector.broadcast %10 : vector<8x2x1xf32> to vector<8x2x8xf32>
    %12 = arith.subf %8, %11 : vector<8x2x8xf32>
    %13 = math.exp %12 : vector<8x2x8xf32>
    %cst_12 = arith.constant dense<0.000000e+00> : vector<8x2xf32>
    %14 = vector.multi_reduction <add>, %13, %cst_12 [2] : vector<8x2x8xf32> to vector<8x2xf32>
    %15 = vector.shape_cast %14 : vector<8x2xf32> to vector<8x2x1xf32>
    %16 = vector.broadcast %15 : vector<8x2x1xf32> to vector<8x2x8xf32>
    %17 = arith.divf %13, %16 : vector<8x2x8xf32>
    %cst_13 = arith.constant 0.000000e+00 : f32
    %18 = vector.broadcast %cst_13 : f32 to vector<8x2x128xf32>
    %c0_14 = arith.constant 0 : index
    %c0_15 = arith.constant 0 : index
    %c0_16 = arith.constant 0 : index
    %19 = vector.load %arg4[%c0_14, %c0_15, %c0_16] : memref<8x2x128xf32, #tpu.memory_space<vmem>>, vector<8x2x128xf32>
    tpu.vector_store %arg4[%c0_14, %c0_15, %c0_16], %18 {strides = array<i32>} : memref<8x2x128xf32, #tpu.memory_space<vmem>>, vector<8x2x128xf32>,
    %c0_17 = arith.constant 0 : index
    %c0_18 = arith.constant 0 : index
    %c0_19 = arith.constant 0 : index
    %20 = vector.load %arg4[%c0_17, %c0_18, %c0_19] : memref<8x2x128xf32, #tpu.memory_space<vmem>>, vector<8x2x8xf32>
    tpu.vector_store %arg4[%c0_17, %c0_18, %c0_19], %17 {strides = array<i32>} : memref<8x2x128xf32, #tpu.memory_space<vmem>>, vector<8x2x8xf32>,
    return
  }
  func.func @transform_0(%arg0: i32) -> (i32, i32, i32) {
    %c0_i32 = arith.constant 0 : i32
    %c0_i32_0 = arith.constant 0 : i32
    %c0_i32_1 = arith.constant 0 : i32
    return %arg0, %c0_i32, %c0_i32_0 : i32, i32, i32
  }
  func.func @transform_1(%arg0: i32) -> (i32, i32, i32) {
    %c0_i32 = arith.constant 0 : i32
    %c0_i32_0 = arith.constant 0 : i32
    %c0_i32_1 = arith.constant 0 : i32
    return %arg0, %c0_i32, %c0_i32_0 : i32, i32, i32
  }
  func.func @transform_2(%arg0: i32) -> (i32, i32, i32) {
    %c0_i32 = arith.constant 0 : i32
    %c0_i32_0 = arith.constant 0 : i32
    %c0_i32_1 = arith.constant 0 : i32
    return %arg0, %c0_i32, %c0_i32_0 : i32, i32, i32
  }
  func.func @transform_3(%arg0: i32) -> (i32, i32, i32) {
    %c0_i32 = arith.constant 0 : i32
    %c0_i32_0 = arith.constant 0 : i32
    %c0_i32_1 = arith.constant 0 : i32
    return %arg0, %c0_i32, %c0_i32_0 : i32, i32, i32
  }
}

</mosaic_0001>

<bundles_post_ra>
// kernel: tpu_custom_call.1
= control target key start
LH: loop header
LB: loop body
LE: loop exit
PB: predicated region body
PF: predicated region fallthrough
CT: control target
= control target key end

     0   :  { %8 = vsyncpa [#allocation3], 0  ;;  %s2548_s0 = inlined_call_operand.vmem [shape: f32[16,2,16], index: 0, kind: input, shape index: {}]   ;;  %s2549_s1 = inlined_call_operand.vmem [shape: f32[16,32,16], index: 1, kind: input, shape index: {}]   ;;  %s2550_s2 = inlined_call_operand.vmem [shape: f32[16,8,32], index: 2, kind: input, shape index: {}]   ;;  %s2551_s3 = inlined_call_operand.hbm [shape: f32[16,2,128], index: 3, kind: output, shape index: {}]  }
   0x1   :  { %10 = vsyncpa [#allocation3 + $0x1], 0  ;;  %s2199_s12 = smov 0   ;;  %s2201_s13 = smov 0  }
   0x2   :  { %s2203_s14 = smov 0   ;;  %s2205_s15 = smov 0  }
   0x3 LB: > { %s2220_s16 = sadd.s32 4294967295, %s2172_s15   ;;  %s1778_s17 = sadd.s32 4294967294, %s2172_s15   ;;  %s2172_s15 = sphi %s2205_s15, %s2557_s15   ;;  %s2168_s14 = sphi %s2203_s14, %s2556_s14   ;;  %s2164_s13 = sphi %s2201_s13, %s2555_s13   ;;  %s2160_s12 = sphi %s2199_s12, %s2554_s12  }
   0x4   : > { %s2224_s18 = sadd.s32 1, %s2172_s15   ;;  %s101_s19 = sadd.s32 1, %s2168_s14 }
   0x5   : > { %s98_s20 = ssub.s32 %s2172_s15, %s2224_s18  ;;  %p111_p0 = scmp.ne.s32.totalorder %s2168_s14, %s2164_s13 }
   0x6   : > { %p99_p1 = scmp.eq.s32.totalorder %s98_s20, 0  ;;  %p112_p2 = scmp.eq.s32.totalorder %s2220_s16, 1 }
   0x7   : > { %p117_p3 = scmp.ne.s32.totalorder %s2164_s13, %s2160_s12  ;;  %p118_p4 = scmp.eq.s32.totalorder %s1778_s17, 1 }
   0x8   : > { %s2235_s21 = scalar_select %p99_p1, %s2168_s14, %s101_s19  }
   0x9   : > { %p2237_p5 = por %p112_p2, %p111_p0  ;;  %p2241_p6 = por %p118_p4, %p117_p3 }
   0xa   : > { %p1781_p7 = scmp.ge.s32.totalorder %s2172_s15, 1  ;;  %p164_p8 = scmp.lt.s32.totalorder %s2172_s15, 3 }
   0xc   : > { %p165_p9 = pnand %p1781_p7, %p164_p8 }
   0xd   : > { %s1783_s24 = sshll.u32 (!%p165_p9), %s2220_s16, 3  ;;  %s196_s10 = sand.u32 (!%p165_p9), 1, %s2164_s13  }
   0xe   : > { %168 = sbr.rel (%p165_p9) target bundleno = 804 (0x324), region = 32  ;;  %p200_p10 = scmp.lt.s32.totalorder (!%p165_p9), %s1783_s24, 15 }
   0xf   : > { %s1782_s11 = sshll.u32 (!%p165_p9), %s196_s10, 4  ;;  %s1852_s19 = sshll.u32 (!%p165_p9), %s2220_s16, 8 }
  0x10   : > { %s2457_s17 = scalar_lea.vmem (!%p165_p9), [#allocation2], %s1782_s11  ;;  %s2498_s26 = scalar_lea.hbm (!%p165_p9), %s2551_s3, %s1852_s19 }
  0x11   : > { %s1692_s20 = sshll.u32 (!%p165_p9), %s2457_s17, 4  ;;  %s2508_s16 = scalar_lea.sflag (!%p165_p9), [#allocation3], %s196_s10  ;;  %s2500_s20 = int_to_ptr.vmem [resolvable:$true] %s1692_s20 }
  0x12   : > { %s2112_s27 = scalar_lea.vmem (!%p165_p9), %s2500_s20, 256 }
  0x13   : > { %v2174_v0 = vmov 0.0   ;;  %vm2175_vm0 = vmmov 0   ;;  %s2559_s24 = smov (!%p200_p10, %s1783_s24), 15  ;;  %vm267_vm1 = vcmask 130048   ;;  %vm956_vm2 = vcmask 261120   ;;  %p2113_p11 = scmp.ne.s32.totalorder %s2500_s20, %s2112_s27 }
  0x14   : > { %1909 = vmatprep.subr.mxu0 %v2174_v0  ;;  %1920 = vmatprep.subr.mxu1 %v2174_v0  ;;  %s1851_s25 = sshll.u32 %s2559_s24, 5  ;;  %s1784_s29 = sshll.u32 %s2559_s24, 1  ;;  %vm1573_vm3 = vcmask 58368   ;;  %1662 = vst [vmem:[%s2457_s17] sm:$0x3] %v2174_v0  ;;  %1663 = vst [vmem:[%s2457_s17 + $0x2] sm:$0x3] %v2174_v0 }
  0x15   : > { %1917 = vmatprep.mubr.msk.f32.mxu0 %vm2175_vm0, %v2174_v0  ;;  %1928 = vmatprep.mubr.msk.f32.mxu1 %vm2175_vm0, %v2174_v0  ;;  %s2260_s28 = scalar_lea.vmem %s2549_s1, %s1851_s25  ;;  %s2286_s5 = scalar_lea.vmem %s2548_s0, %s1784_s29  ;;  %1664 = vst [vmem:[%s2457_s17 + $0x4] sm:$0x3] %v2174_v0  ;;  %1665 = vst [vmem:[%s2457_s17 + $0x6] sm:$0x3] %v2174_v0 }
  0x16   : > { %v230_v1 = vld [vmem:[%s2260_s28 + $0x18] sm:$0xff]  ;;  %v229_v3 = vld [vmem:[%s2260_s28 + $0x10] sm:$0xff]  ;;  %v228_v5 = vld [vmem:[%s2260_s28 + $0x8] sm:$0xff]  ;;  %s1789_s6 = sshll.u32 %s2559_s24, 3  ;;  %1666 = vst [vmem:[%s2457_s17 + $0x8] sm:$0x3] %v2174_v0  ;;  %p2114_p12 = pnand %p2113_p11, %p2237_p5 }
  0x17   : > { %v234_v2 = vld [vmem:[%s2260_s28 + $0x38] sm:$0xff]  ;;  %1910 = vmatpush3.xpose.msk.msra.mxu0 %vm267_vm1, %v230_v1  ;;  %v233_v4 = vld [vmem:[%s2260_s28 + $0x30] sm:$0xff]  ;;  %v232_v6 = vld [vmem:[%s2260_s28 + $0x28] sm:$0xff]  ;;  %s2400_s9 = scalar_lea.vmem %s2550_s2, %s1789_s6  ;;  %1667 = vst [vmem:[%s2457_s17 + $0xa] sm:$0x3] %v2174_v0 }
  0x18   : > { %1921 = vmatpush3.xpose.msk.msra.mxu1 %vm267_vm1, %v234_v2  ;;  %1911 = vmatprep.subr.mxu0 %v2174_v0  ;;  %v227_v7 = vld [vmem:[%s2260_s28] sm:$0xff]  ;;  %v238_v11 = vld [vmem:[%s2260_s28 + $0x58] sm:$0xff]  ;;  %v237_v13 = vld [vmem:[%s2260_s28 + $0x50] sm:$0xff]  ;;  %1668 = vst [vmem:[%s2457_s17 + $0xc] sm:$0x3] %v2174_v0  ;;  %p2115_p13 = pneg %p2114_p12 }
  0x19   : > { %1922 = vmatprep.subr.mxu1 %v2174_v0  ;;  %v231_v8 = vld [vmem:[%s2260_s28 + $0x20] sm:$0xff]  ;;  %v242_v12 = vld [vmem:[%s2260_s28 + $0x78] sm:$0xff]  ;;  %v241_v14 = vld [vmem:[%s2260_s28 + $0x70] sm:$0xff]  ;;  %1669 = vst [vmem:[%s2457_s17 + $0xe] sm:$0x3] %v2174_v0 }
  0x1a   : > { %v219_v9 = vld [vmem:[%s2286_s5] sm:$0x3]  ;;  %v220_v10 = vld [vmem:[%s2286_s5 + $0x2] sm:$0x3]  ;;  %v236_v15 = vld [vmem:[%s2260_s28 + $0x48] sm:$0xff] }
  0x1b   : > { %1912 = vmatpush3.xpose.msk.msra.mxu0 %vm267_vm1, %v229_v3  ;;  %v240_v16 = vld [vmem:[%s2260_s28 + $0x68] sm:$0xff]  ;;  %v235_v17 = vld [vmem:[%s2260_s28 + $0x40] sm:$0xff]  ;;  %v246_v21 = vld [vmem:[%s2260_s28 + $0x98] sm:$0xff] }
  0x1c   : > { %1923 = vmatpush3.xpose.msk.msra.mxu1 %vm267_vm1, %v233_v4  ;;  %1913 = vmatprep.subr.mxu0 %v2174_v0  ;;  %v239_v18 = vld [vmem:[%s2260_s28 + $0x60] sm:$0xff]  ;;  %v250_v22 = vld [vmem:[%s2260_s28 + $0xb8] sm:$0xff]  ;;  %v245_v23 = vld [vmem:[%s2260_s28 + $0x90] sm:$0xff] }
  0x1d   : > { %1924 = vmatprep.subr.mxu1 %v2174_v0  ;;  %v221_v19 = vld [vmem:[%s2286_s5 + $0x4] sm:$0x3]  ;;  %v222_v20 = vld [vmem:[%s2286_s5 + $0x6] sm:$0x3]  ;;  %v249_v24 = vld [vmem:[%s2260_s28 + $0xb0] sm:$0xff] }
  0x1e   : > { %v244_v25 = vld [vmem:[%s2260_s28 + $0x88] sm:$0xff]  ;;  %v243_v27 = vld [vmem:[%s2260_s28 + $0x80] sm:$0xff]  ;;  %v254_v31 = vld [vmem:[%s2260_s28 + $0xd8] sm:$0xff] }
  0x1f   : > { %1914 = vmatpush3.xpose.msk.msra.mxu0 %vm267_vm1, %v228_v5  ;;  %v248_v26 = vld [vmem:[%s2260_s28 + $0xa8] sm:$0xff]  ;;  %v247_v28 = vld [vmem:[%s2260_s28 + $0xa0] sm:$0xff]  ;;  %v258_v32 = vld [vmem:[%s2260_s28 + $0xf8] sm:$0xff] }
  0x20   : > { %1925 = vmatpush3.xpose.msk.msra.mxu1 %vm267_vm1, %v232_v6  ;;  %1915 = vmatprep.subr.mxu0 %v2174_v0  ;;  %v223_v29 = vld [vmem:[%s2286_s5 + $0x8] sm:$0x3]  ;;  %v224_v30 = vld [vmem:[%s2286_s5 + $0xa] sm:$0x3]  ;;  %v253_v33 = vld [vmem:[%s2260_s28 + $0xd0] sm:$0xff] }
  0x21   : > { %1926 = vmatprep.subr.mxu1 %v2174_v0  ;;  %v257_v34 = vld [vmem:[%s2260_s28 + $0xf0] sm:$0xff]  ;;  %v252_v35 = vld [vmem:[%s2260_s28 + $0xc8] sm:$0xff]  ;;  %v251_v37 = vld [vmem:[%s2260_s28 + $0xc0] sm:$0xff] }
  0x22   : > { %v256_v36 = vld [vmem:[%s2260_s28 + $0xe8] sm:$0xff]  ;;  %v255_v38 = vld [vmem:[%s2260_s28 + $0xe0] sm:$0xff]  ;;  %v261_v47 = vld [vmem:[%s2400_s9 + $0x10] sm:$0xff]  ;;  %s2176_s28 = smov [#allocation2]  }
  0x23   : > { %1916 = vmatpush3.xpose.msk.msra.mxu0 %vm267_vm1, %v227_v7  ;;  %v225_v39 = vld [vmem:[%s2286_s5 + $0xc] sm:$0x3]  ;;  %v226_v40 = vld [vmem:[%s2286_s5 + $0xe] sm:$0x3]  ;;  %v259_v41 = vld [vmem:[%s2400_s9] sm:$0xff]  ;;  %s2116_s29 = sshll.u32 %s2176_s28, 4  ;;  %s2117_s29 = int_to_ptr.vmem [resolvable:$false] %s2116_s29 }
  0x24   : > { %1927 = vmatpush3.xpose.msk.msra.mxu1 %vm267_vm1, %v231_v8  ;;  %1931 = vmatprep.subr.mxu0 %v2174_v0  ;;  %v260_v42 = vld [vmem:[%s2400_s9 + $0x8] sm:$0xff]  ;;  %v262_v48 = vld [vmem:[%s2400_s9 + $0x18] sm:$0xff]  ;;  %v263_v55 = vld [vmem:[%s2400_s9 + $0x20] sm:$0xff]  ;;  %s2118_s30 = scalar_lea.vmem %s2117_s29, 512  ;;  %p2119_p0 = scmp.lt.s32.totalorder %s2500_s20, %s2117_s29 }
  0x25   : > { %1942 = vmatprep.subr.mxu1 %v2174_v0  ;;  %v264_v56 = vld [vmem:[%s2400_s9 + $0x28] sm:$0xff]  ;;  %v265_v63 = vld [vmem:[%s2400_s9 + $0x30] sm:$0xff]  ;;  %v266_v1 = vld [vmem:[%s2400_s9 + $0x38] sm:$0xff]  ;;  %p2120_p1 = scmp.lt.s32.totalorder %s2118_s30, %s2112_s27 }
  0x26   : > { %1918 = vmatmul.mubr.msk.f32.vlgmr.msra.gmra.mxu0 %vm267_vm1, %v219_v9 }
  0x27   : > { %1929 = vmatmul.mubr.msk.f32.vlgmr.msra.gmra.mxu1 %vm267_vm1, %v220_v10  ;;  %1932 = vmatpush3.xpose.msk.msra.mxu0 %vm267_vm1, %v238_v11  ;;  %p2121_p2 = por %p2120_p1, %p2119_p0 }
  0x28   : > { %1943 = vmatpush3.xpose.msk.msra.mxu1 %vm267_vm1, %v242_v12  ;;  %1933 = vmatprep.subr.mxu0 %v2174_v0 }
  0x29   : > { %1944 = vmatprep.subr.mxu1 %v2174_v0  ;;  %1939 = vmatprep.mubr.msk.f32.mxu0 %vm2175_vm0, %v2174_v0  ;;  %p2122_p3 = pnand %p2121_p2, %p2115_p13 }
  0x2a   : > { %1950 = vmatprep.mubr.msk.f32.mxu1 %vm2175_vm0, %v2174_v0 }
  0x2b   : > { %1934 = vmatpush3.xpose.msk.msra.mxu0 %vm267_vm1, %v237_v13 }
  0x2c   : > { %1945 = vmatpush3.xpose.msk.msra.mxu1 %vm267_vm1, %v241_v14  ;;  %1935 = vmatprep.subr.mxu0 %v2174_v0 }
  0x2d   : > { %1946 = vmatprep.subr.mxu1 %v2174_v0 }
  0x2f   : > { %1936 = vmatpush3.xpose.msk.msra.mxu0 %vm267_vm1, %v236_v15 }
  0x30   : > { %1947 = vmatpush3.xpose.msk.msra.mxu1 %vm267_vm1, %v240_v16  ;;  %1937 = vmatprep.subr.mxu0 %v2174_v0 }
  0x31   : > { %1948 = vmatprep.subr.mxu1 %v2174_v0 }
  0x33   : > { %1938 = vmatpush3.xpose.msk.msra.mxu0 %vm267_vm1, %v235_v17 }
  0x34   : > { %1949 = vmatpush3.xpose.msk.msra.mxu1 %vm267_vm1, %v239_v18  ;;  %1953 = vmatprep.subr.mxu0 %v2174_v0 }
  0x35   : > { %1964 = vmatprep.subr.mxu1 %v2174_v0 }
  0x36   : > { %1940 = vmatmul.mubr.msk.f32.vlgmr.msra.gmra.mxu0 %vm267_vm1, %v221_v19 }
  0x37   : > { %1951 = vmatmul.mubr.msk.f32.vlgmr.msra.gmra.mxu1 %vm267_vm1, %v222_v20  ;;  %1954 = vmatpush3.xpose.msk.msra.mxu0 %vm267_vm1, %v246_v21 }
  0x38   : > { %1965 = vmatpush3.xpose.msk.msra.mxu1 %vm267_vm1, %v250_v22  ;;  %1955 = vmatprep.subr.mxu0 %v2174_v0 }
  0x39   : > { %1966 = vmatprep.subr.mxu1 %v2174_v0  ;;  %1961 = vmatprep.mubr.msk.f32.mxu0 %vm2175_vm0, %v2174_v0 }
  0x3a   : > { %1972 = vmatprep.mubr.msk.f32.mxu1 %vm2175_vm0, %v2174_v0 }
  0x3b   : > { %1956 = vmatpush3.xpose.msk.msra.mxu0 %vm267_vm1, %v245_v23 }
  0x3c   : > { %1967 = vmatpush3.xpose.msk.msra.mxu1 %vm267_vm1, %v249_v24  ;;  %1957 = vmatprep.subr.mxu0 %v2174_v0 }
  0x3d   : > { %1968 = vmatprep.subr.mxu1 %v2174_v0 }
  0x3f   : > { %1958 = vmatpush3.xpose.msk.msra.mxu0 %vm267_vm1, %v244_v25 }
  0x40   : > { %1969 = vmatpush3.xpose.msk.msra.mxu1 %vm267_vm1, %v248_v26  ;;  %1959 = vmatprep.subr.mxu0 %v2174_v0 }
  0x41   : > { %1970 = vmatprep.subr.mxu1 %v2174_v0 }
  0x43   : > { %1960 = vmatpush3.xpose.msk.msra.mxu0 %vm267_vm1, %v243_v27 }
  0x44   : > { %1971 = vmatpush3.xpose.msk.msra.mxu1 %vm267_vm1, %v247_v28  ;;  %1975 = vmatprep.subr.mxu0 %v2174_v0 }
  0x45   : > { %1986 = vmatprep.subr.mxu1 %v2174_v0 }
  0x46   : > { %1962 = vmatmul.mubr.msk.f32.vlgmr.msra.gmra.mxu0 %vm267_vm1, %v223_v29 }
  0x47   : > { %1973 = vmatmul.mubr.msk.f32.vlgmr.msra.gmra.mxu1 %vm267_vm1, %v224_v30  ;;  %1976 = vmatpush3.xpose.msk.msra.mxu0 %vm267_vm1, %v254_v31 }
  0x48   : > { %1987 = vmatpush3.xpose.msk.msra.mxu1 %vm267_vm1, %v258_v32  ;;  %1977 = vmatprep.subr.mxu0 %v2174_v0 }
  0x49   : > { %1988 = vmatprep.subr.mxu1 %v2174_v0  ;;  %1983 = vmatprep.mubr.msk.f32.mxu0 %vm2175_vm0, %v2174_v0 }
  0x4a   : > { %1994 = vmatprep.mubr.msk.f32.mxu1 %vm2175_vm0, %v2174_v0 }
  0x4b   : > { %1978 = vmatpush3.xpose.msk.msra.mxu0 %vm267_vm1, %v253_v33 }
  0x4c   : > { %1989 = vmatpush3.xpose.msk.msra.mxu1 %vm267_vm1, %v257_v34  ;;  %1979 = vmatprep.subr.mxu0 %v2174_v0 }
  0x4d   : > { %1990 = vmatprep.subr.mxu1 %v2174_v0 }
  0x4f   : > { %1980 = vmatpush3.xpose.msk.msra.mxu0 %vm267_vm1, %v252_v35 }
  0x50   : > { %1991 = vmatpush3.xpose.msk.msra.mxu1 %vm267_vm1, %v256_v36  ;;  %1981 = vmatprep.subr.mxu0 %v2174_v0 }
  0x51   : > { %1992 = vmatprep.subr.mxu1 %v2174_v0 }
  0x53   : > { %1982 = vmatpush3.xpose.msk.msra.mxu0 %vm267_vm1, %v251_v37 }
  0x54   : > { %1993 = vmatpush3.xpose.msk.msra.mxu1 %vm267_vm1, %v255_v38  ;;  %1997 = vmatprep.subr.mxu0 %v2174_v0 }
  0x55   : > { %2002 = vmatprep.subr.mxu1 %v2174_v0 }
  0x56   : > { %1984 = vmatmul.mubr.msk.f32.vlgmr.msra.gmra.mxu0 %vm267_vm1, %v225_v39 }
  0x57   : > { %1995 = vmatmul.mubr.msk.f32.vlgmr.msra.gmra.mxu1 %vm267_vm1, %v226_v40  ;;  %1999 = vmatprep.mubr.msk.f32.mxu0 %vm2175_vm0, %v2174_v0 }
  0x58   : > { %2004 = vmatprep.mubr.msk.f32.mxu1 %vm2175_vm0, %v2174_v0  ;;  %1998 = vmatpush3.xpose.msk.msra.mxu0 %vm956_vm2, %v259_v41 }
  0x59   : > { %2003 = vmatpush3.xpose.msk.msra.mxu1 %vm956_vm2, %v260_v42  ;;  %2007 = vmatprep.subr.mxu0 %v2174_v0 }
  0x5a   : > { %2012 = vmatprep.subr.mxu1 %v2174_v0 }
  0xe6   : > { %v349_v43 = vpop.f32.mrf.mxu0 }
  0xe7   : > { %v434_v44 = vpop.f32.mrf.mxu1  ;;  %v948_v45 = vmax.f32 %v349_v43, 0.0 }
  0xe8   : > { %v949_v46 = vmax.f32 %v434_v44, 0.0  ;;  %v1919_v49 = vpop.f32.mrf.mxu0 }
  0xe9   : > { %v1930_v50 = vpop.f32.mrf.mxu1  ;;  %2000 = vmatmul.mubr.msk.f32.vlgmr.msra.gmra.mxu0 %vm956_vm2, %v948_v45 }
  0xea   : > { %2005 = vmatmul.mubr.msk.f32.vlgmr.msra.gmra.mxu1 %vm956_vm2, %v949_v46  ;;  %2008 = vmatpush3.xpose.msk.msra.mxu0 %vm956_vm2, %v261_v47 }
  0xeb   : > { %2013 = vmatpush3.xpose.msk.msra.mxu1 %vm956_vm2, %v262_v48  ;;  %2009 = vmatprep.mubr.msk.f32.mxu0 %vm2175_vm0, %v2174_v0 }
  0xec   : > { %2014 = vmatprep.mubr.msk.f32.mxu1 %vm2175_vm0, %v2174_v0  ;;  %2017 = vmatprep.subr.mxu0 %v2174_v0 }
  0xed   : > { %2022 = vmatprep.subr.mxu1 %v2174_v0 }
  0xf6   : > { %v519_v51 = vpop.f32.mrf.mxu0 }
  0xf7   : > { %v604_v52 = vpop.f32.mrf.mxu1  ;;  %v950_v53 = vmax.f32 %v519_v51, 0.0 }
  0xf8   : > { %v951_v54 = vmax.f32 %v604_v52, 0.0  ;;  %v1941_v57 = vpop.f32.mrf.mxu0 }
  0xf9   : > { %v1952_v58 = vpop.f32.mrf.mxu1  ;;  %2010 = vmatmul.mubr.msk.f32.vlgmr.msra.gmra.mxu0 %vm956_vm2, %v950_v53 }
  0xfa   : > { %2015 = vmatmul.mubr.msk.f32.vlgmr.msra.gmra.mxu1 %vm956_vm2, %v951_v54  ;;  %2018 = vmatpush3.xpose.msk.msra.mxu0 %vm956_vm2, %v263_v55 }
  0xfb   : > { %2023 = vmatpush3.xpose.msk.msra.mxu1 %vm956_vm2, %v264_v56  ;;  %2019 = vmatprep.mubr.msk.f32.mxu0 %vm2175_vm0, %v2174_v0 }
  0xfc   : > { %2024 = vmatprep.mubr.msk.f32.mxu1 %vm2175_vm0, %v2174_v0  ;;  %2027 = vmatprep.subr.mxu0 %v2174_v0 }
  0xfd   : > { %2032 = vmatprep.subr.mxu1 %v2174_v0 }
 0x106   : > { %v689_v59 = vpop.f32.mrf.mxu0 }
 0x107   : > { %v774_v60 = vpop.f32.mrf.mxu1  ;;  %v952_v61 = vmax.f32 %v689_v59, 0.0 }
 0x108   : > { %v953_v62 = vmax.f32 %v774_v60, 0.0  ;;  %v1963_v2 = vpop.f32.mrf.mxu0 }
 0x109   : > { %v1974_v3 = vpop.f32.mrf.mxu1  ;;  %2020 = vmatmul.mubr.msk.f32.vlgmr.msra.gmra.mxu0 %vm956_vm2, %v952_v61 }
 0x10a   : > { %2025 = vmatmul.mubr.msk.f32.vlgmr.msra.gmra.mxu1 %vm956_vm2, %v953_v62  ;;  %2028 = vmatpush3.xpose.msk.msra.mxu0 %vm956_vm2, %v265_v63 }
 0x10b   : > { %2033 = vmatpush3.xpose.msk.msra.mxu1 %vm956_vm2, %v266_v1  ;;  %2029 = vmatprep.mubr.msk.f32.mxu0 %vm2175_vm0, %v2174_v0 }
 0x10c   : > { %2034 = vmatprep.mubr.msk.f32.mxu1 %vm2175_vm0, %v2174_v0 }
 0x116   : > { %v859_v4 = vpop.f32.mrf.mxu0 }
 0x117   : > { %v944_v5 = vpop.f32.mrf.mxu1  ;;  %v954_v6 = vmax.f32 %v859_v4, 0.0 }
 0x118   : > { %v955_v7 = vmax.f32 %v944_v5, 0.0  ;;  %v1985_v8 = vpop.f32.mrf.mxu0 }
 0x119   : > { %v1996_v9 = vpop.f32.mrf.mxu1  ;;  %2030 = vmatmul.mubr.msk.f32.vlgmr.msra.gmra.mxu0 %vm956_vm2, %v954_v6 }
 0x11a   : > { %2035 = vmatmul.mubr.msk.f32.vlgmr.msra.gmra.mxu1 %vm956_vm2, %v955_v7 }
 0x1a9   : > { %v1029_v10 = vpop.f32.mrf.mxu0 }
 0x1aa   : > { %v1105_v11 = vpop.f32.mrf.mxu1  ;;  %v1565_v12 = vmax.f32 %v1029_v10, 0.0 }
 0x1ab   : > { %v2001_v13 = vpop.f32.mrf.mxu0  ;;  %v1566_v15 = vmax.f32 %v1105_v11, 0.0 }
 0x1ac   : > { %v2006_v14 = vpop.f32.mrf.mxu1  ;;  %v1574_v16 = vsel %vm1573_vm3, %v1565_v12, -inf }
 0x1ad   : > { %1575 = vmax.xlane.f32.xlu0 %v1574_v16  ;;  %v1577_v17 = vsel %vm1573_vm3, %v1566_v15, -inf }
 0x1b1   : > { %1578 = vmax.xlane.f32.xlu0 %v1577_v17 }
 0x1b9   : > { %v1181_v18 = vpop.f32.mrf.mxu0 }
 0x1ba   : > { %v1257_v19 = vpop.f32.mrf.mxu1  ;;  %v1567_v20 = vmax.f32 %v1181_v18, 0.0 }
 0x1bb   : > { %v2011_v21 = vpop.f32.mrf.mxu0  ;;  %v1568_v23 = vmax.f32 %v1257_v19, 0.0 }
 0x1bc   : > { %v2016_v22 = vpop.f32.mrf.mxu1  ;;  %v1580_v24 = vsel %vm1573_vm3, %v1567_v20, -inf }
 0x1bd   : > { %1581 = vmax.xlane.f32.xlu1 %v1580_v24  ;;  %v1583_v25 = vsel %vm1573_vm3, %v1568_v23, -inf }
 0x1c1   : > { %1584 = vmax.xlane.f32.xlu1 %v1583_v25 }
 0x1c9   : > { %v1333_v26 = vpop.f32.mrf.mxu0 }
 0x1ca   : > { %v1409_v27 = vpop.f32.mrf.mxu1  ;;  %v1569_v28 = vmax.f32 %v1333_v26, 0.0 }
 0x1cb   : > { %v1570_v29 = vmax.f32 %v1409_v27, 0.0  ;;  %v2021_v30 = vpop.f32.mrf.mxu0 }
 0x1cc   : > { %v2026_v31 = vpop.f32.mrf.mxu1  ;;  %v1586_v33 = vsel %vm1573_vm3, %v1569_v28, -inf }
 0x1cd   : > { %v1589_v32 = vsel %vm1573_vm3, %v1570_v29, -inf  ;;  %1587 = vmax.xlane.f32.xlu0 %v1586_v33 }
 0x1ce   : > { %1590 = vmax.xlane.f32.xlu1 %v1589_v32 }
 0x1d9   : > { %v1485_v34 = vpop.f32.mrf.mxu0 }
 0x1da   : > { %v1561_v35 = vpop.f32.mrf.mxu1  ;;  %v1571_v36 = vmax.f32 %v1485_v34, 0.0 }
 0x1db   : > { %v1572_v37 = vmax.f32 %v1561_v35, 0.0  ;;  %v2031_v38 = vpop.f32.mrf.mxu0 }
 0x1dc   : > { %v2036_v39 = vpop.f32.mrf.mxu1  ;;  %v1592_v41 = vsel %vm1573_vm3, %v1571_v36, -inf }
 0x1dd   : > { %v1595_v40 = vsel %vm1573_vm3, %v1572_v37, -inf  ;;  %1593 = vmax.xlane.f32.xlu0 %v1592_v41 }
 0x1de   : > { %1596 = vmax.xlane.f32.xlu1 %v1595_v40 }
 0x236   : > { %v1576_v42 = vpop.xlane.xlu0 %1575 }
 0x237   : > { %v1598_v43 = vsub.f32 %v1565_v12, %v1576_v42 }
 0x239   : > { %v1606_v44 = vmul.f32 1.442695, %v1598_v43 }
 0x23a   : > { %v1579_v45 = vpop.xlane.xlu0 %1578 }
 0x23b   : > { %2080 = vpow2.f32 %v1606_v44  ;;  %v1599_v46 = vsub.f32 %v1566_v15, %v1579_v45 }
 0x23d   : > { %v1608_v47 = vmul.f32 1.442695, %v1599_v46 }
 0x23f   : > { %2082 = vpow2.f32 %v1608_v47 }
 0x246   : > { %v1582_v48 = vpop.xlane.xlu1 %1581 }
 0x247   : > { %v1600_v49 = vsub.f32 %v1567_v20, %v1582_v48 }
 0x248   : > { %v2081_v50 = vpop.eup %2080 }
 0x249   : > { %v1610_v51 = vmul.f32 1.442695, %v1600_v49  ;;  %v1622_v52 = vsel %vm1573_vm3, %v2081_v50, 0.0 }
 0x24a   : > { %v1585_v53 = vpop.xlane.xlu1 %1584  ;;  %1623 = vadd.xlane.f32.xlu0 %v1622_v52 }
 0x24b   : > { %2084 = vpow2.f32 %v1610_v51  ;;  %v1601_v54 = vsub.f32 %v1568_v23, %v1585_v53 }
 0x24c   : > { %v2083_v55 = vpop.eup %2082 }
 0x24d   : > { %v1612_v56 = vmul.f32 1.442695, %v1601_v54  ;;  %v1625_v57 = vsel %vm1573_vm3, %v2083_v55, 0.0 }
 0x24e   : > { %1626 = vadd.xlane.f32.xlu1 %v1625_v57 }
 0x24f   : > { %2086 = vpow2.f32 %v1612_v56 }
 0x256   : > { %v1588_v59 = vpop.xlane.xlu0 %1587 }
 0x257   : > { %v1591_v58 = vpop.xlane.xlu1 %1590  ;;  %v1602_v61 = vsub.f32 %v1569_v28, %v1588_v59 }
 0x258   : > { %v1603_v60 = vsub.f32 %v1570_v29, %v1591_v58  ;;  %v2085_v62 = vpop.eup %2084 }
 0x259   : > { %v1614_v1 = vmul.f32 1.442695, %v1602_v61  ;;  %v1628_v2 = vsel %vm1573_vm3, %v2085_v62, 0.0 }
 0x25a   : > { %v1616_v63 = vmul.f32 1.442695, %v1603_v60  ;;  %1629 = vadd.xlane.f32.xlu0 %v1628_v2 }
 0x25c   : > { %2088 = vpow2.f32 %v1616_v63  ;;  %v2087_v3 = vpop.eup %2086 }
 0x25d   : > { %2090 = vpow2.f32 %v1614_v1  ;;  %v1631_v4 = vsel %vm1573_vm3, %v2087_v3, 0.0 }
 0x25e   : > { %1632 = vadd.xlane.f32.xlu1 %v1631_v4 }
 0x266   : > { %v1594_v6 = vpop.xlane.xlu0 %1593 }
 0x267   : > { %v1597_v5 = vpop.xlane.xlu1 %1596  ;;  %v1604_v8 = vsub.f32 %v1571_v36, %v1594_v6 }
 0x268   : > { %v1605_v7 = vsub.f32 %v1572_v37, %v1597_v5 }
 0x269   : > { %v2089_v9 = vpop.eup %2088  ;;  %v1618_v11 = vmul.f32 1.442695, %v1604_v8 }
 0x26a   : > { %v2091_v0 = vpop.eup %2090  ;;  %v1620_v10 = vmul.f32 1.442695, %v1605_v7  ;;  %v1637_v12 = vsel %vm1573_vm3, %v2089_v9, 0.0 }
 0x26b   : > { %1638 = vadd.xlane.f32.xlu1 %v1637_v12  ;;  %v1634_v13 = vsel %vm1573_vm3, %v2091_v0, 0.0 }
 0x26c   : > { %2092 = vpow2.f32 %v1620_v10  ;;  %1635 = vadd.xlane.f32.xlu0 %v1634_v13 }
 0x26d   : > { %2094 = vpow2.f32 %v1618_v11 }
 0x279   : > { %v2093_v14 = vpop.eup %2092 }
 0x27a   : > { %v2095_v15 = vpop.eup %2094  ;;  %v1643_v16 = vsel %vm1573_vm3, %v2093_v14, 0.0 }
 0x27b   : > { %1644 = vadd.xlane.f32.xlu1 %v1643_v16  ;;  %v1640_v17 = vsel %vm1573_vm3, %v2095_v15, 0.0 }
 0x27c   : > { %1641 = vadd.xlane.f32.xlu0 %v1640_v17 }
 0x2d3   : > { %v1624_v18 = vpop.xlane.xlu0 %1623 }
 0x2d4   : > { %2096 = vrcp.f32 %v1624_v18 }
 0x2d7   : > { %v1627_v19 = vpop.xlane.xlu1 %1626 }
 0x2d8   : > { %2098 = vrcp.f32 %v1627_v19 }
 0x2e1   : > { %v2097_v20 = vpop.eup %2096 }
 0x2e2   : > { %v1647_v21 = vmul.f32 %v2097_v20, %v2081_v50 }
 0x2e3   : > { %v1630_v22 = vpop.xlane.xlu0 %1629 }
 0x2e4   : > { %1670 = vst.msk [vmem:[%s2457_s17] sm:$0x3] %vm1573_vm3, %v1647_v21  ;;  %2100 = vrcp.f32 %v1630_v22 }
 0x2e5   : > { %v2099_v23 = vpop.eup %2098 }
 0x2e6   : > { %v1649_v24 = vmul.f32 %v2099_v23, %v2083_v55 }
 0x2e7   : > { %v1633_v25 = vpop.xlane.xlu1 %1632 }
 0x2e8   : > { %1671 = vst.msk [vmem:[%s2457_s17 + $0x2] sm:$0x3] %vm1573_vm3, %v1649_v24  ;;  %2102 = vrcp.f32 %v1633_v25 }
 0x2f1   : > { %v2101_v26 = vpop.eup %2100 }
 0x2f2   : > { %v1651_v27 = vmul.f32 %v2101_v26, %v2085_v62 }
 0x2f4   : > { %v1639_v28 = vpop.xlane.xlu1 %1638  ;;  %1672 = vst.msk [vmem:[%s2457_s17 + $0x4] sm:$0x3] %vm1573_vm3, %v1651_v27 }
 0x2f5   : > { %2104 = vrcp.f32 %v1639_v28  ;;  %v1636_v29 = vpop.xlane.xlu0 %1635  ;;  %v2103_v30 = vpop.eup %2102 }
 0x2f6   : > { %2106 = vrcp.f32 %v1636_v29  ;;  %v1653_v31 = vmul.f32 %v2103_v30, %v2087_v3 }
 0x2f8   : > { %1673 = vst.msk [vmem:[%s2457_s17 + $0x6] sm:$0x3] %vm1573_vm3, %v1653_v31 }
 0x302   : > { %v2105_v32 = vpop.eup %2104 }
 0x303   : > { %v2107_v33 = vpop.eup %2106  ;;  %v1657_v34 = vmul.f32 %v2105_v32, %v2089_v9 }
 0x304   : > { %v1655_v35 = vmul.f32 %v2107_v33, %v2091_v0  ;;  %v1645_v36 = vpop.xlane.xlu1 %1644 }
 0x305   : > { %1675 = vst.msk [vmem:[%s2457_s17 + $0xa] sm:$0x3] %vm1573_vm3, %v1657_v34  ;;  %2108 = vrcp.f32 %v1645_v36  ;;  %v1642_v37 = vpop.xlane.xlu0 %1641 }
 0x306   : > { %1674 = vst.msk [vmem:[%s2457_s17 + $0x8] sm:$0x3] %vm1573_vm3, %v1655_v35  ;;  %2110 = vrcp.f32 %v1642_v37 }
 0x312   : > { %v2109_v38 = vpop.eup %2108 }
 0x313   : > { %v2111_v39 = vpop.eup %2110  ;;  %v1661_v40 = vmul.f32 %v2109_v38, %v2093_v14 }
 0x314   : > { %v1659_v41 = vmul.f32 %v2111_v39, %v2095_v15 }
 0x315   : > { %1677 = vst.msk [vmem:[%s2457_s17 + $0xe] sm:$0x3] %vm1573_vm3, %v1661_v40 }
 0x316   : > { %1676 = vst.msk [vmem:[%s2457_s17 + $0xc] sm:$0x3] %vm1573_vm3, %v1659_v41 }
 0x317   : > { %2125 = shalt.err (!%p2122_p3)
}
 0x318   : > { %s2126_s4 = scalar_lea.hbm %s2498_s26, 256  ;;  %s2130_s7 = scalar_lea.hbm %s2551_s3, 512 }
 0x319   : > { %p2127_p4 = scmp.ne.s32.totalorder %s2498_s26, %s2126_s4  ;;  %p2131_p9 = scmp.lt.s32.totalorder %s2498_s26, %s2551_s3 }
 0x31a   : > { %p2132_p10 = scmp.lt.s32.totalorder %s2130_s7, %s2126_s4 }
 0x31b   : > { %p2128_p7 = pnand %p2127_p4, %p2237_p5 }
 0x31c   : > { %p2133_p11 = por %p2132_p10, %p2131_p9 }
 0x31d   : > { %p2129_p8 = pneg %p2128_p7 }
 0x31f   : > { %p2134_p12 = pnand %p2133_p11, %p2129_p8 }
 0x321   : > { %2137 = shalt.err (!%p2134_p12)
}
 0x322   : > { %s2177_s10 = smov 32   ;;  %s2178_s11 = smov 2  }
 0x323   : > { %2037 = dma.vmem_to_hbm [thread:$0]  (%p2237_p5), %s2500_s20, 256, %s2498_s26, %s2508_s16, %s2177_s10, %s2177_s10, %s2178_s11  }
 0x324 PF: > { %p2043_p13 = scmp.ge.s32.totalorder %s2172_s15, 2  ;;  %s1707_s17 = sand.u32 1, %s2160_s12  }
 0x325   : > { %s1708_s19 = scalar_lea.sflag [#allocation3], %s1707_s17 }
 0x326   : > { %p2040_p0 = pnand %p2043_p13, %p2241_p6 }
 0x328   : > { %p2041_p1 = pneg %p2040_p0 }
 0x32a   : > { %2155 = dma.done.wait (%p2041_p1), %s1708_s19, 256  }
 0x32b   : > { %2157 = vsyncadd (%p2041_p1), %s1708_s19, 4294967040  ;;  %p13_p2 = scmp.ge.s32.totalorder %s2224_s18, 4   ;;  %s2554_s12 = smov %s2164_s13 }
 0x32c   : > { %s2555_s13 = smov %s2168_s14  ;;  %s2556_s14 = smov %s2235_s21 }
 0x32d   : > { %s2557_s15 = smov %s2224_s18  ;;  %15 = sbr.rel (!%p13_p2) target bundleno = 3 (0x3), region = 73 }
 0x332   :  { %1713 = vsyncpa [#allocation3], 1 }
 0x333   :  { %1715 = vsyncpa [#allocation3 + $0x1], 1 }

</bundles_post_ra>
